<compile_context>
chip_gen: v7x
topology: tpu7x:2x2x1
jax: 0.10.0
libtpu: 0.0.40
codegen_flags: <defaults>
</compile_context>

<pallas_src>
import functools

import jax
import jax.numpy as jnp
from jax import lax
from jax.experimental import pallas as pl
from jax.experimental.pallas import tpu as pltpu

LANES = 128
MAX_TILE_ROWS = 2048  # (2048, 128) f32 block = 1 MiB per input per pipeline buffer


def _round_up(x, m):
    return (x + m - 1) // m * m


def _focal_loss_kernel(pred_ref, gt_ref, out_ref, *,
                       tile_rows, inner, total_rows, need_mask):
    k = pl.program_id(1)

    @pl.when(k == 0)
    def _init():
        out_ref[...] = jnp.zeros_like(out_ref)

    # Cast in-kernel (free VPU filler); wrapper passes the original dtype.
    pred = pred_ref[...].astype(jnp.float32)
    gt = gt_ref[...].astype(jnp.float32)

    pos_mask = gt > 0.33
    neg_mask = gt < 0.33

    if need_mask:
        # Mask rows belonging to padded / duplicated (clamped) blocks.
        blk = pl.program_id(0) * inner + k
        row_ids = (lax.broadcasted_iota(jnp.int32, pred.shape, 0)
                   + blk * tile_rows)
        valid = row_ids < total_rows
        pos_mask = jnp.logical_and(pos_mask, valid)
        neg_mask = jnp.logical_and(neg_mask, valid)

    one_minus_pred = 1.0 - pred
    # pos and neg are mutually exclusive -> a single log (EUP op) suffices.
    logx = jnp.log(jnp.where(pos_mask, pred, one_minus_pred))

    pos_term = jnp.where(pos_mask, logx * one_minus_pred * one_minus_pred, 0.0)
    neg_w = jnp.square(jnp.square(1.0 - gt))
    neg_term = jnp.where(neg_mask, logx * pred * pred * neg_w, 0.0)

    # Per-lane partial sums only (sublane reduce); cross-lane reduce happens
    # once, outside the kernel.
    pos_part = jnp.sum(pos_term, axis=0, keepdims=True)                   # (1, LANES)
    neg_part = jnp.sum(neg_term, axis=0, keepdims=True)                   # (1, LANES)
    npos_part = jnp.sum(pos_mask.astype(jnp.float32), axis=0, keepdims=True)

    upd = jnp.concatenate([pos_part, neg_part, npos_part], axis=0)        # (3, LANES)
    out_ref[...] += upd[None, :, :]


@functools.partial(jax.jit, static_argnames=("max_tile_rows",))
def focal_loss(pred, gt, *, max_tile_rows=MAX_TILE_ROWS):
    """CornerNet focal loss, matching the provided torch _slow_neg_loss."""
    assert pred.shape == gt.shape
    n = pred.size

    # Row alignment so that blocks of packed dtypes stay tile-friendly.
    min_itemsize = min(jnp.dtype(pred.dtype).itemsize, jnp.dtype(gt.dtype).itemsize)
    row_align = 8 * max(1, 4 // min_itemsize)

    rows_raw = pl.cdiv(n, LANES)
    total_rows = _round_up(rows_raw, row_align)
    pad = total_rows * LANES - n

    p_flat = pred.reshape(-1)
    g_flat = gt.reshape(-1)
    if pad:
        # Zero padding contributes exactly 0 to pos/neg/npos sums
        # (gt=0 -> neg, and log(1-0) * 0^2 * 1 == 0).
        p_flat = jnp.pad(p_flat, (0, pad))
        g_flat = jnp.pad(g_flat, (0, pad))
    p2 = p_flat.reshape(total_rows, LANES)
    g2 = g_flat.reshape(total_rows, LANES)

    tile_rows = min(max_tile_rows, total_rows)
    n_blocks = pl.cdiv(total_rows, tile_rows)
    outer = 2 if n_blocks >= 2 else 1          # megacore sharding axis (v7x)
    inner = pl.cdiv(n_blocks, outer)
    need_mask = (outer * inner * tile_rows) != total_rows
    max_blk = n_blocks - 1

    kernel = functools.partial(
        _focal_loss_kernel,
        tile_rows=tile_rows,
        inner=inner,
        total_rows=total_rows,
        need_mask=need_mask,
    )

    def in_map(i, k):
        # Clamp so no block DMA starts fully out of bounds; duplicated blocks
        # are masked out inside the kernel via the row-index check.
        return (jnp.minimum(i * inner + k, max_blk), 0)

    partials = pl.pallas_call(
        kernel,
        out_shape=jax.ShapeDtypeStruct((outer, 3, LANES), jnp.float32),
        grid_spec=pltpu.PrefetchScalarGridSpec(
            num_scalar_prefetch=0,
            grid=(outer, inner),
            in_specs=[
                pl.BlockSpec((tile_rows, LANES), in_map),
                pl.BlockSpec((tile_rows, LANES), in_map),
            ],
            out_specs=pl.BlockSpec((1, 3, LANES), lambda i, k: (i, 0, 0)),
        ),
        compiler_params=pltpu.CompilerParams(
            dimension_semantics=("parallel", "arbitrary"),
        ),
    )(p2, g2)

    # Tiny final reductions + conditional normalization as scalar JAX glue.
    pos_sum = jnp.sum(partials[:, 0, :])
    neg_sum = jnp.sum(partials[:, 1, :])
    num_pos = jnp.sum(partials[:, 2, :])
    return jnp.where(num_pos == 0.0, -neg_sum, -(pos_sum + neg_sum) / num_pos)


def _ref_focal_loss(pred, gt):
    pred = pred.astype(jnp.float32)
    gt = gt.astype(jnp.float32)
    pos = gt > 0.33
    neg = gt < 0.33
    pos_loss = jnp.sum(jnp.where(pos, jnp.log(pred) * (1.0 - pred) ** 2, 0.0))
    neg_loss = jnp.sum(
        jnp.where(neg, jnp.log(1.0 - pred) * pred**2 * (1.0 - gt) ** 4, 0.0)
    )
    num_pos = jnp.sum(pos.astype(jnp.float32))
    return jnp.where(num_pos == 0.0, -neg_loss, -(pos_loss + neg_loss) / num_pos)


if __name__ == "__main__":
    key = jax.random.PRNGKey(0)
    k1, k2, k3, k4 = jax.random.split(key, 4)

    # NCHW heatmaps: batch=2, channels=4, spatial=16x16 (aligned fast path).
    shape = (2, 4, 16, 16)
    pred = jax.nn.sigmoid(jax.random.normal(k1, shape, dtype=jnp.float32))
    gt = jax.random.uniform(k2, shape, dtype=jnp.float32)

    loss = jax.block_until_ready(focal_loss(pred, gt))
    ref = jax.block_until_ready(_ref_focal_loss(pred, gt))
    assert jnp.allclose(loss, ref, rtol=1e-5, atol=1e-5), (loss, ref)

    # Second small case exercising the multi-block grid, block clamping and
    # in-kernel tail masking (forced via a tiny max_tile_rows).
    shape2 = (2, 4, 16, 24)  # 3072 elems -> 24 rows -> 3 blocks of 8 rows
    pred2 = jax.nn.sigmoid(jax.random.normal(k3, shape2, dtype=jnp.float32))
    gt2 = jax.random.uniform(k4, shape2, dtype=jnp.float32)

    loss2 = jax.block_until_ready(focal_loss(pred2, gt2, max_tile_rows=8))
    ref2 = jax.block_until_ready(_ref_focal_loss(pred2, gt2))
    assert jnp.allclose(loss2, ref2, rtol=1e-5, atol=1e-5), (loss2, ref2)

    print("KERNEL_OK")
</pallas_src>

<mosaic_0001>
module attributes {stable_mosaic.version = 11 : i64} {
  func.func @_focal_loss_kernel(%arg0: i32, %arg1: i32, %arg2: memref<16x128xf32, #tpu.memory_space<vmem>>, %arg3: memref<16x128xf32, #tpu.memory_space<vmem>>, %arg4: memref<1x3x128xf32, #tpu.memory_space<vmem>>) attributes {dimension_semantics = [#tpu.dimension_semantics<parallel>, #tpu.dimension_semantics<arbitrary>], iteration_bounds = array<i64: 1, 1>, scalar_prefetch = 0 : i64, scratch_operands = 0 : i64, tpu.core_type = #tpu.core_type<tc>, window_params = [{transform_indices = @transform_0, window_bounds = array<i64: 16, 128>}, {transform_indices = @transform_1, window_bounds = array<i64: 16, 128>}, {transform_indices = @transform_2, window_bounds = array<i64: 1, 3, 128>}]} {
    %c0_i32 = arith.constant 0 : i32
    %0 = arith.cmpi eq, %arg1, %c0_i32 : i32
    %1 = arith.extui %0 : i1 to i32
    %c0_i32_0 = arith.constant 0 : i32
    %2 = arith.cmpi ne, %1, %c0_i32_0 : i32
    scf.if %2 {
      %cst_18 = arith.constant 0.000000e+00 : f32
      %39 = vector.broadcast %cst_18 : f32 to vector<1x3x128xf32>
      %c0_19 = arith.constant 0 : index
      %c0_20 = arith.constant 0 : index
      %c0_21 = arith.constant 0 : index
      %40 = vector.load %arg4[%c0_19, %c0_20, %c0_21] : memref<1x3x128xf32, #tpu.memory_space<vmem>>, vector<1x3x128xf32>
      tpu.vector_store %arg4[%c0_19, %c0_20, %c0_21], %39 {strides = array<i32>} : memref<1x3x128xf32, #tpu.memory_space<vmem>>, vector<1x3x128xf32>,
    } else {
    }
    %c0 = arith.constant 0 : index
    %c0_1 = arith.constant 0 : index
    %3 = vector.load %arg2[%c0, %c0_1] : memref<16x128xf32, #tpu.memory_space<vmem>>, vector<16x128xf32>
    %c0_2 = arith.constant 0 : index
    %c0_3 = arith.constant 0 : index
    %4 = vector.load %arg3[%c0_2, %c0_3] : memref<16x128xf32, #tpu.memory_space<vmem>>, vector<16x128xf32>
    %cst = arith.constant 3.300000e-01 : f32
    %5 = vector.broadcast %cst : f32 to vector<16x128xf32>
    %6 = arith.cmpf ogt, %4, %5 : vector<16x128xf32>
    %cst_4 = arith.constant 3.300000e-01 : f32
    %7 = vector.broadcast %cst_4 : f32 to vector<16x128xf32>
    %8 = arith.cmpf olt, %4, %7 : vector<16x128xf32>
    %cst_5 = arith.constant 1.000000e+00 : f32
    %9 = vector.broadcast %cst_5 : f32 to vector<16x128xf32>
    %10 = arith.subf %9, %3 : vector<16x128xf32>
    %11 = arith.select %6, %3, %10 : vector<16x128xi1>, vector<16x128xf32>
    %12 = math.log %11 : vector<16x128xf32>
    %13 = arith.mulf %12, %10 : vector<16x128xf32>
    %14 = arith.mulf %13, %10 : vector<16x128xf32>
    %cst_6 = arith.constant 0.000000e+00 : f32
    %15 = vector.broadcast %cst_6 : f32 to vector<16x128xf32>
    %16 = arith.select %6, %14, %15 : vector<16x128xi1>, vector<16x128xf32>
    %cst_7 = arith.constant 1.000000e+00 : f32
    %17 = vector.broadcast %cst_7 : f32 to vector<16x128xf32>
    %18 = arith.subf %17, %4 : vector<16x128xf32>
    %19 = arith.mulf %18, %18 : vector<16x128xf32>
    %20 = arith.mulf %19, %19 : vector<16x128xf32>
    %21 = arith.mulf %12, %3 : vector<16x128xf32>
    %22 = arith.mulf %21, %3 : vector<16x128xf32>
    %23 = arith.mulf %22, %20 : vector<16x128xf32>
    %cst_8 = arith.constant 0.000000e+00 : f32
    %24 = vector.broadcast %cst_8 : f32 to vector<16x128xf32>
    %25 = arith.select %8, %23, %24 : vector<16x128xi1>, vector<16x128xf32>
    %cst_9 = arith.constant dense<0.000000e+00> : vector<128xf32>
    %26 = vector.multi_reduction <add>, %16, %cst_9 [0] : vector<16x128xf32> to vector<128xf32>
    %27 = vector.shape_cast %26 : vector<128xf32> to vector<1x128xf32>
    %cst_10 = arith.constant dense<0.000000e+00> : vector<128xf32>
    %28 = vector.multi_reduction <add>, %25, %cst_10 [0] : vector<16x128xf32> to vector<128xf32>
    %29 = vector.shape_cast %28 : vector<128xf32> to vector<1x128xf32>
    %30 = arith.extui %6 : vector<16x128xi1> to vector<16x128xi32>
    %31 = arith.sitofp %30 : vector<16x128xi32> to vector<16x128xf32>
    %cst_11 = arith.constant dense<0.000000e+00> : vector<128xf32>
    %32 = vector.multi_reduction <add>, %31, %cst_11 [0] : vector<16x128xf32> to vector<128xf32>
    %33 = vector.shape_cast %32 : vector<128xf32> to vector<1x128xf32>
    %34 = tpu.concatenate %27, %29, %33 in 0 : vector<1x128xf32>, vector<1x128xf32>, vector<1x128xf32> -> vector<3x128xf32>
    %c0_12 = arith.constant 0 : index
    %c0_13 = arith.constant 0 : index
    %c0_14 = arith.constant 0 : index
    %35 = vector.load %arg4[%c0_12, %c0_13, %c0_14] : memref<1x3x128xf32, #tpu.memory_space<vmem>>, vector<1x3x128xf32>
    %36 = vector.shape_cast %34 : vector<3x128xf32> to vector<1x3x128xf32>
    %37 = arith.addf %35, %36 : vector<1x3x128xf32>
    %c0_15 = arith.constant 0 : index
    %c0_16 = arith.constant 0 : index
    %c0_17 = arith.constant 0 : index
    %38 = vector.load %arg4[%c0_15, %c0_16, %c0_17] : memref<1x3x128xf32, #tpu.memory_space<vmem>>, vector<1x3x128xf32>
    tpu.vector_store %arg4[%c0_15, %c0_16, %c0_17], %37 {strides = array<i32>} : memref<1x3x128xf32, #tpu.memory_space<vmem>>, vector<1x3x128xf32>,
    return
  }
  func.func @transform_0(%arg0: i32, %arg1: i32) -> (i32, i32) {
    %c1_i32 = arith.constant 1 : i32
    %0 = arith.muli %arg0, %c1_i32 : i32
    %1 = arith.addi %0, %arg1 : i32
    %c0_i32 = arith.constant 0 : i32
    %2 = arith.minsi %1, %c0_i32 : i32
    %c0_i32_0 = arith.constant 0 : i32
    %c0_i32_1 = arith.constant 0 : i32
    return %2, %c0_i32_0 : i32, i32
  }
  func.func @transform_1(%arg0: i32, %arg1: i32) -> (i32, i32) {
    %c1_i32 = arith.constant 1 : i32
    %0 = arith.muli %arg0, %c1_i32 : i32
    %1 = arith.addi %0, %arg1 : i32
    %c0_i32 = arith.constant 0 : i32
    %2 = arith.minsi %1, %c0_i32 : i32
    %c0_i32_0 = arith.constant 0 : i32
    %c0_i32_1 = arith.constant 0 : i32
    return %2, %c0_i32_0 : i32, i32
  }
  func.func @transform_2(%arg0: i32, %arg1: i32) -> (i32, i32, i32) {
    %c0_i32 = arith.constant 0 : i32
    %c0_i32_0 = arith.constant 0 : i32
    %c0_i32_1 = arith.constant 0 : i32
    return %arg0, %c0_i32, %c0_i32_0 : i32, i32, i32
  }
}

</mosaic_0001>

<bundles_post_ra>
// kernel: focal_loss.1
= control target key start
LH: loop header
LB: loop body
LE: loop exit
PB: predicated region body
PF: predicated region fallthrough
CT: control target
= control target key end

     0   :  { %v171_v0 = vmov 0.0   ;;  %vm141_vm4 = vcmask 1040384   ;;  %vm143_vm5 = vcmask 1041408   ;;  %s214_s0 = inlined_call_operand.vmem [shape: f32[16,128], index: 0, kind: input, shape index: {}]   ;;  %s215_s1 = inlined_call_operand.vmem [shape: f32[16,128], index: 1, kind: input, shape index: {}]   ;;  %s216_s2 = inlined_call_operand.vmem [shape: f32[1,3,128], index: 2, kind: output, shape index: {}]  }
   0x1   :  { %79 = vst [vmem:[%s216_s2] sm:$0x7] %v171_v0  ;;  %v80_v1 = vld [vmem:[%s214_s0] sm:$0xff]  ;;  %v81_v2 = vld [vmem:[%s214_s0 + $0x8] sm:$0xff] }
   0x2   :  { %v82_v3 = vld [vmem:[%s215_s1] sm:$0xff]  ;;  %v83_v4 = vld [vmem:[%s215_s1 + $0x8] sm:$0xff]  ;;  %v88_v5 = vsub.f32 1.0, %v80_v1  ;;  %v89_v6 = vsub.f32 1.0, %v81_v2 }
   0x3   :  { %vm84_vm0 = vcmp.gt.f32.partialorder %v82_v3, 0.33  ;;  %vm85_vm1 = vcmp.gt.f32.partialorder %v83_v4, 0.33  ;;  %v102_v9 = vsub.f32 1.0, %v82_v3  ;;  %v103_v12 = vsub.f32 1.0, %v83_v4 }
   0x4   :  { %v90_v7 = vsel %vm84_vm0, %v80_v1, %v88_v5  ;;  %v91_v8 = vsel %vm85_vm1, %v81_v2, %v89_v6  ;;  %v164_v10 = vsel %vm84_vm0, 1.0, %v171_v0  ;;  %v165_v11 = vsel %vm85_vm1, 1.0, %v171_v0 }
   0x5   :  { %167 = vlog2.f32 %v90_v7  ;;  %v134_v13 = vadd.f32 %v165_v11, %v164_v10  ;;  %v104_v14 = vmul.f32 %v102_v9, %v102_v9  ;;  %v105_v16 = vmul.f32 %v103_v12, %v103_v12 }
   0x6   :  { %169 = vlog2.f32 %v91_v8  ;;  %vm86_vm2 = vcmp.lt.f32.partialorder %v82_v3, 0.33  ;;  %vm87_vm3 = vcmp.lt.f32.partialorder %v83_v4, 0.33 }
   0x7   :  { %v135_v20 = vrot.slane %v134_v13, 4  ;;  %v106_v22 = vmul.f32 %v104_v14, %v104_v14  ;;  %v107_v25 = vmul.f32 %v105_v16, %v105_v16 }
   0x8   :  { %v145_v56 = vld [vmem:[%s216_s2] sm:$0x7] }
   0x9   :  { %v136_v31 = vadd.f32 %v135_v20, %v134_v13 }
   0xb   :  { %v137_v39 = vrot.slane %v136_v31, 2 }
   0xd   :  { %v138_v44 = vadd.f32 %v137_v39, %v136_v31 }
   0xf   :  { %v168_v15 = vpop.eup %167  ;;  %v139_v49 = vrot.slane %v138_v44, 1 }
  0x10   :  { %v170_v17 = vpop.eup %169  ;;  %v93_v18 = vmul.f32 0.6931472, %v168_v15 }
  0x11   :  { %v95_v19 = vmul.f32 0.6931472, %v170_v17  ;;  %v140_v54 = vadd.f32 %v139_v49, %v138_v44 }
  0x12   :  { %v96_v21 = vmul.f32 %v93_v18, %v88_v5  ;;  %v108_v23 = vmul.f32 %v93_v18, %v80_v1 }
  0x13   :  { %v97_v24 = vmul.f32 %v95_v19, %v89_v6  ;;  %v109_v26 = vmul.f32 %v95_v19, %v81_v2 }
  0x14   :  { %v98_v27 = vmul.f32 %v96_v21, %v88_v5  ;;  %v110_v28 = vmul.f32 %v108_v23, %v80_v1 }
  0x15   :  { %v99_v29 = vmul.f32 %v97_v24, %v89_v6  ;;  %v111_v30 = vmul.f32 %v109_v26, %v81_v2 }
  0x16   :  { %v100_v32 = vsel %vm84_vm0, %v98_v27, 0.0  ;;  %v112_v33 = vmul.f32 %v110_v28, %v106_v22 }
  0x17   :  { %v101_v34 = vsel %vm85_vm1, %v99_v29, 0.0  ;;  %v113_v35 = vmul.f32 %v111_v30, %v107_v25 }
  0x18   :  { %v114_v36 = vsel %vm86_vm2, %v112_v33, 0.0  ;;  %v116_v37 = vadd.f32 %v101_v34, %v100_v32 }
  0x19   :  { %v115_v38 = vsel %vm87_vm3, %v113_v35, 0.0 }
  0x1a   :  { %v117_v40 = vrot.slane %v116_v37, 4  ;;  %v123_v41 = vadd.f32 %v115_v38, %v114_v36 }
  0x1c   :  { %v118_v42 = vadd.f32 %v117_v40, %v116_v37  ;;  %v124_v43 = vrot.slane %v123_v41, 4 }
  0x1e   :  { %v119_v45 = vrot.slane %v118_v42, 2  ;;  %v125_v46 = vadd.f32 %v124_v43, %v123_v41 }
  0x20   :  { %v120_v47 = vadd.f32 %v119_v45, %v118_v42  ;;  %v126_v48 = vrot.slane %v125_v46, 2 }
  0x22   :  { %v121_v50 = vrot.slane %v120_v47, 1  ;;  %v127_v51 = vadd.f32 %v126_v48, %v125_v46 }
  0x24   :  { %v122_v52 = vadd.f32 %v121_v50, %v120_v47  ;;  %v128_v53 = vrot.slane %v127_v51, 1 }
  0x26   :  { %v129_v55 = vadd.f32 %v128_v53, %v127_v51 }
  0x28   :  { %v142_v57 = vsel %vm141_vm4, %v122_v52, %v129_v55 }
  0x29   :  { %v144_v58 = vsel %vm143_vm5, %v142_v57, %v140_v54 }
  0x2a   :  { %v146_v59 = vadd.f32 %v145_v56, %v144_v58 }
  0x2c   :  { %147 = vst [vmem:[%s216_s2] sm:$0x7] %v146_v59 }

</bundles_post_ra>
